<compile_context>
chip_gen: v5e
topology: v5e:2x2
jax: 0.10.0
libtpu: 0.0.40
codegen_flags: <defaults>
</compile_context>

<pallas_src>
import jax
import jax.numpy as jnp
from jax.experimental import pallas as pl
from jax.experimental.pallas import tpu as pltpu


# ----------------------------- kernels ------------------------------------- #

def gcn_fused_kernel(a_ref, xw1_ref, b1_ref, w2t_ref, b2_ref, o_ref):
    """Whole graph resident: out = Â·relu(Â·XW1 + b1)·W2ᵀ + b2 (Â read once).

    a_ref  : [Np, Np] bf16   normalized adjacency (padded)
    xw1_ref: [Np, Hp] bf16   X @ W1ᵀ (precomputed, padded)
    b1_ref : [1,  Hp] f32
    w2t_ref: [Hp, Ep] bf16
    b2_ref : [1,  Ep] f32
    o_ref  : [Np, Ep] f32
    """
    h = jnp.dot(a_ref[...], xw1_ref[...], preferred_element_type=jnp.float32)
    h = jnp.maximum(h + b1_ref[...], 0.0)
    # dropout(0.1): identity in eval mode (see TODO at top)
    hw2 = jnp.dot(h.astype(jnp.bfloat16), w2t_ref[...],
                  preferred_element_type=jnp.float32)
    out = jnp.dot(a_ref[...], hw2.astype(jnp.bfloat16),
                  preferred_element_type=jnp.float32)
    o_ref[...] = (out + b2_ref[...]).astype(o_ref.dtype)


def gcn_stage1_kernel(a_ref, xw1_ref, b1_ref, w2t_ref, hw2_ref, acc_ref):
    """K-tiled: HW2_i = relu(sum_k Â[i,k]·XW1[k] + b1) @ W2ᵀ.

    a_ref  : [T, T]   bf16   Â block (row stripe i, K chunk k)
    xw1_ref: [T, Hp]  bf16   XW1 K-slice
    b1_ref : [1, Hp]  f32
    w2t_ref: [Hp, Ep] bf16
    hw2_ref: [T, Ep]  bf16   output (written at last K chunk)
    acc_ref: [T, Hp]  f32    VMEM accumulator
    """
    k = pl.program_id(1)

    @pl.when(k == 0)
    def _():
        acc_ref[...] = jnp.zeros_like(acc_ref)

    acc_ref[...] += jnp.dot(a_ref[...], xw1_ref[...],
                            preferred_element_type=jnp.float32)

    @pl.when(k == pl.num_programs(1) - 1)
    def _():
        h = jnp.maximum(acc_ref[...] + b1_ref[...], 0.0)
        # dropout(0.1): identity in eval mode
        hw2_ref[...] = jnp.dot(h.astype(jnp.bfloat16), w2t_ref[...],
                               preferred_element_type=jnp.float32
                               ).astype(hw2_ref.dtype)


def gcn_stage2_kernel(a_ref, hw2_ref, b2_ref, o_ref, acc_ref):
    """K-tiled: out_i = sum_k Â[i,k]·HW2[k] + b2.

    a_ref  : [T, T]  bf16
    hw2_ref: [T, Ep] bf16
    b2_ref : [1, Ep] f32
    o_ref  : [T, Ep] f32
    acc_ref: [T, Ep] f32
    """
    k = pl.program_id(1)

    @pl.when(k == 0)
    def _():
        acc_ref[...] = jnp.zeros_like(acc_ref)

    acc_ref[...] += jnp.dot(a_ref[...], hw2_ref[...],
                            preferred_element_type=jnp.float32)

    @pl.when(k == pl.num_programs(1) - 1)
    def _():
        o_ref[...] = (acc_ref[...] + b2_ref[...]).astype(o_ref.dtype)


# ----------------------------- helpers -------------------------------------- #

def _round_up(v, m):
    return (v + m - 1) // m * m


def _vmem_budget():
    """Per-generation VMEM budget + vmem_limit_bytes (v7x: ~53 MiB of 64;
    v5e/v6e: ~107 MiB of 128). Conservative fallback if the query fails."""
    try:
        cap = int(pltpu.get_tpu_info().vmem_capacity_bytes)
    except Exception:
        cap = 64 * 1024 * 1024
    limit = int(cap * 0.84)                 # headroom for compiler scratch / sems
    budget = limit - 4 * 1024 * 1024        # slack vs. our own accounting error
    return budget, limit


def _fused_footprint(n_pad, h_pad, e_pad):
    """VMEM bytes for the fused (whole-graph-resident) kernel, conservatively
    assuming every pipelined buffer is duplicated (grid=(1,) double-buffering)."""
    f = n_pad * n_pad * 2                   # Â (bf16)
    f += n_pad * h_pad * 2                  # XW1
    f += h_pad * e_pad * 2                  # W2ᵀ
    f += 8 * (h_pad + e_pad) * 4            # biases (sublane-padded)
    f += n_pad * e_pad * 4                  # output (f32)
    f += n_pad * h_pad * 4                  # temp h (f32)
    f += n_pad * e_pad * 6                  # temp hw2 (f32 + bf16 copy)
    return 2 * f


def _two_pass_footprint(t, h_pad, e_pad):
    """Worst-stage VMEM bytes for the K-tiled two-pass path at tile size t
    (double-buffered inputs/outputs + f32 accumulator + epilogue temporaries)."""
    s1 = 2 * (t * t * 2)                    # Â block
    s1 += 2 * (t * h_pad * 2)               # XW1 K-slice
    s1 += 2 * (h_pad * e_pad * 2)           # W2ᵀ (grid-invariant, 2 buffers)
    s1 += 2 * (8 * h_pad * 4)               # b1
    s1 += 2 * (t * e_pad * 2)               # HW2 output block
    s1 += t * h_pad * 4                     # accumulator scratch
    s1 += 2 * t * max(h_pad, e_pad) * 4     # epilogue temporaries headroom

    s2 = 2 * (t * t * 2)                    # Â block
    s2 += 2 * (t * e_pad * 2)               # HW2 K-slice
    s2 += 2 * (8 * e_pad * 4)               # b2
    s2 += 2 * (t * e_pad * 4)               # f32 output block
    s2 += t * e_pad * 4                     # accumulator scratch
    return max(s1, s2)


def _select_tile(n128, budget, h_pad, e_pad):
    """Largest 128-multiple tile whose full two-pass footprint fits the budget."""
    cands = sorted({c for c in (n128, 2048, 1024, 512, 256, 128) if c <= n128},
                   reverse=True)
    for t in cands:
        if _two_pass_footprint(t, h_pad, e_pad) <= budget:
            return t
    return 128


def build_normalized_adjacency_padded(edge_index, n, n_pad, dtype=jnp.bfloat16):
    """D^{-1/2}(A+I)D^{-1/2}, built directly into a zero-padded [n_pad,n_pad]
    matrix (no dense f32 n×n intermediate). Assumes de-duplicated edge_index."""
    src, dst = edge_index
    deg = jnp.ones((n,), jnp.float32).at[src].add(1.0)      # +1 self-loop
    dinv = 1.0 / jnp.sqrt(deg)
    vals = dinv[src] * dinv[dst]
    a = jnp.zeros((n_pad, n_pad), dtype)
    a = a.at[src, dst].set(vals.astype(dtype))
    diag = jnp.arange(n)
    a = a.at[diag, diag].set((dinv * dinv).astype(dtype))
    return a


def normalized_adjacency_dense(edge_index, n):
    """f32 dense version of the same normalization (reference only)."""
    src, dst = edge_index
    deg = jnp.ones((n,), jnp.float32).at[src].add(1.0)
    dinv = 1.0 / jnp.sqrt(deg)
    a = jnp.zeros((n, n), jnp.float32).at[src, dst].set(dinv[src] * dinv[dst])
    diag = jnp.arange(n)
    a = a.at[diag, diag].set(dinv * dinv)
    return a


# ----------------------------- wrapper -------------------------------------- #

def gnn_forward(x, edge_index, params):
    """Two-layer GCN forward (eval mode) via Pallas TPU kernels."""
    w1, b1, w2, b2 = params
    n, f = x.shape
    h_dim = w1.shape[0]
    e_dim = w2.shape[0]

    n128 = _round_up(max(n, 1), 128)
    h_pad = _round_up(h_dim, 128)
    e_pad = _round_up(e_dim, 128)

    budget, vmem_limit = _vmem_budget()

    # Path selection with full VMEM accounting.
    if _fused_footprint(n128, h_pad, e_pad) <= budget:
        t = None
        n_pad = n128
    else:
        t = _select_tile(n128, budget, h_pad, e_pad)
        n_pad = _round_up(n, t)

    # ---- one-time XLA-side prep: XW1 precompute + padded bf16 operands ----
    xw1 = x.astype(jnp.float32) @ w1.astype(jnp.float32).T          # [n, H]
    xw1_p = jnp.zeros((n_pad, h_pad), jnp.bfloat16).at[:n, :h_dim].set(
        xw1.astype(jnp.bfloat16))
    a_p = build_normalized_adjacency_padded(edge_index, n, n_pad)
    w2t = jnp.zeros((h_pad, e_pad), jnp.bfloat16).at[:h_dim, :e_dim].set(
        w2.T.astype(jnp.bfloat16))
    b1_p = jnp.zeros((1, h_pad), jnp.float32).at[:, :h_dim].set(b1[None, :])
    b2_p = jnp.zeros((1, e_pad), jnp.float32).at[:, :e_dim].set(b2[None, :])

    if t is None:
        # ---- fused path: Â read from HBM exactly once ----
        out = pl.pallas_call(
            gcn_fused_kernel,
            out_shape=jax.ShapeDtypeStruct((n_pad, e_pad), jnp.float32),
            grid=(1,),
            in_specs=[
                pl.BlockSpec((n_pad, n_pad), lambda i: (0, 0)),
                pl.BlockSpec((n_pad, h_pad), lambda i: (0, 0)),
                pl.BlockSpec((1, h_pad), lambda i: (0, 0)),
                pl.BlockSpec((h_pad, e_pad), lambda i: (0, 0)),
                pl.BlockSpec((1, e_pad), lambda i: (0, 0)),
            ],
            out_specs=pl.BlockSpec((n_pad, e_pad), lambda i: (0, 0)),
            compiler_params=pltpu.CompilerParams(
                dimension_semantics=("arbitrary",),
                vmem_limit_bytes=vmem_limit),
        )(a_p, xw1_p, b1_p, w2t, b2_p)
    else:
        # ---- tiled two-pass path: 2-D grid (row stripe, K chunk) ----
        grid = (n_pad // t, n_pad // t)
        cparams = pltpu.CompilerParams(
            dimension_semantics=("parallel", "arbitrary"),
            vmem_limit_bytes=vmem_limit)

        hw2 = pl.pallas_call(
            gcn_stage1_kernel,
            out_shape=jax.ShapeDtypeStruct((n_pad, e_pad), jnp.bfloat16),
            grid=grid,
            in_specs=[
                pl.BlockSpec((t, t), lambda i, k: (i, k)),         # Â block
                pl.BlockSpec((t, h_pad), lambda i, k: (k, 0)),     # XW1 K-slice
                pl.BlockSpec((1, h_pad), lambda i, k: (0, 0)),     # b1
                pl.BlockSpec((h_pad, e_pad), lambda i, k: (0, 0)), # W2ᵀ
            ],
            out_specs=pl.BlockSpec((t, e_pad), lambda i, k: (i, 0)),
            scratch_shapes=[pltpu.VMEM((t, h_pad), jnp.float32)],
            compiler_params=cparams,
        )(a_p, xw1_p, b1_p, w2t)

        out = pl.pallas_call(
            gcn_stage2_kernel,
            out_shape=jax.ShapeDtypeStruct((n_pad, e_pad), jnp.float32),
            grid=grid,
            in_specs=[
                pl.BlockSpec((t, t), lambda i, k: (i, k)),         # Â block
                pl.BlockSpec((t, e_pad), lambda i, k: (k, 0)),     # HW2 K-slice
                pl.BlockSpec((1, e_pad), lambda i, k: (0, 0)),     # b2
            ],
            out_specs=pl.BlockSpec((t, e_pad), lambda i, k: (i, 0)),
            scratch_shapes=[pltpu.VMEM((t, e_pad), jnp.float32)],
            compiler_params=cparams,
        )(a_p, hw2, b2_p)

    return out[:n, :e_dim]


# ----------------------------- init / reference ----------------------------- #

def init_params(key, num_features, encoder_dim, hidden=128):
    """Deterministic glorot-style init; W shapes follow PyTorch [out, in]."""
    k1, k2 = jax.random.split(key)

    def glorot(k, shape):
        fan_out, fan_in = shape
        scale = jnp.sqrt(6.0 / (fan_in + fan_out))
        return jax.random.uniform(k, shape, jnp.float32, -scale, scale)

    w1 = glorot(k1, (hidden, num_features))
    b1 = jnp.zeros((hidden,), jnp.float32)
    w2 = glorot(k2, (encoder_dim, hidden))
    b2 = jnp.zeros((encoder_dim,), jnp.float32)
    return w1, b1, w2, b2


def reference_forward(x, edge_index, params):
    """Pure-JAX f32 reference of the same forward pass (eval mode)."""
    a_hat = normalized_adjacency_dense(edge_index, x.shape[0])
    w1, b1, w2, b2 = params
    h = a_hat @ (x @ w1.T) + b1
    h = jnp.maximum(h, 0.0)
    return a_hat @ (h @ w2.T) + b2


# ----------------------------- demo ----------------------------------------- #

if __name__ == "__main__":
    key = jax.random.PRNGKey(0)
    k_x, k_p = jax.random.split(key)

    # Small, module-consistent shapes: N=16 nodes, num_features=32,
    # hidden=128 (fixed by GNN.__init__), encoder_dim=64.
    N, NUM_FEATURES, ENCODER_DIM = 16, 32, 64

    x = jax.random.normal(k_x, (N, NUM_FEATURES), jnp.float32)

    # Deterministic ring graph, both directions (no duplicate edges).
    src = jnp.arange(N, dtype=jnp.int32)
    dst = (src + 1) % N
    edge_index = jnp.stack(
        [jnp.concatenate([src, dst]), jnp.concatenate([dst, src])], axis=0
    )

    params = init_params(k_p, NUM_FEATURES, ENCODER_DIM)

    out = gnn_forward(x, edge_index, params)
    out = jax.block_until_ready(out)

    ref = reference_forward(x, edge_index, params)
    assert out.shape == (N, ENCODER_DIM)
    # bf16 matmul inputs (f32 accumulation) -> slightly looser tolerance vs f32 ref.
    assert jnp.allclose(out, ref, atol=1e-1, rtol=5e-2), float(
        jnp.max(jnp.abs(out - ref)))

    print("KERNEL_OK")
</pallas_src>

<mosaic_0001>
module attributes {stable_mosaic.version = 11 : i64} {
  func.func @gcn_fused_kernel(%arg0: i32, %arg1: memref<128x128xbf16, #tpu.memory_space<vmem>>, %arg2: memref<128x128xbf16, #tpu.memory_space<vmem>>, %arg3: memref<1x128xf32, #tpu.memory_space<vmem>>, %arg4: memref<128x128xbf16, #tpu.memory_space<vmem>>, %arg5: memref<1x128xf32, #tpu.memory_space<vmem>>, %arg6: memref<128x128xf32, #tpu.memory_space<vmem>>) attributes {dimension_semantics = [#tpu.dimension_semantics<arbitrary>], iteration_bounds = array<i64: 1>, scalar_prefetch = 0 : i64, scratch_operands = 0 : i64, tpu.core_type = #tpu.core_type<tc>, window_params = [{pipeline_mode = #tpu.pipeline_mode<synchronous>, transform_indices = @transform_0, window_bounds = array<i64: 128, 128>}, {pipeline_mode = #tpu.pipeline_mode<synchronous>, transform_indices = @transform_1, window_bounds = array<i64: 128, 128>}, {pipeline_mode = #tpu.pipeline_mode<synchronous>, transform_indices = @transform_2, window_bounds = array<i64: 1, 128>}, {pipeline_mode = #tpu.pipeline_mode<synchronous>, transform_indices = @transform_3, window_bounds = array<i64: 128, 128>}, {pipeline_mode = #tpu.pipeline_mode<synchronous>, transform_indices = @transform_4, window_bounds = array<i64: 1, 128>}, {pipeline_mode = #tpu.pipeline_mode<synchronous>, transform_indices = @transform_5, window_bounds = array<i64: 128, 128>}]} {
    %c0 = arith.constant 0 : index
    %c0_0 = arith.constant 0 : index
    %0 = vector.load %arg1[%c0, %c0_0] : memref<128x128xbf16, #tpu.memory_space<vmem>>, vector<128x128xbf16>
    %c0_1 = arith.constant 0 : index
    %c0_2 = arith.constant 0 : index
    %1 = vector.load %arg2[%c0_1, %c0_2] : memref<128x128xbf16, #tpu.memory_space<vmem>>, vector<128x128xbf16>
    %cst = arith.constant dense<0.000000e+00> : vector<128x128xf32>
    %2 = tpu.matmul %0, %1, %cst {dimension_numbers = #tpu.dot_dimension_numbers<[1], [0], [0], [1], [0, 0, 1, 1], [], []>} : vector<128x128xbf16>, vector<128x128xbf16>, vector<128x128xf32> -> vector<128x128xf32>
    %c0_3 = arith.constant 0 : index
    %c0_4 = arith.constant 0 : index
    %3 = vector.load %arg3[%c0_3, %c0_4] : memref<1x128xf32, #tpu.memory_space<vmem>>, vector<1x128xf32>
    %4 = vector.broadcast %3 : vector<1x128xf32> to vector<128x128xf32>
    %5 = arith.addf %2, %4 : vector<128x128xf32>
    %cst_5 = arith.constant 0.000000e+00 : f32
    %6 = vector.broadcast %cst_5 : f32 to vector<128x128xf32>
    %7 = arith.maximumf %5, %6 : vector<128x128xf32>
    %8 = arith.truncf %7 : vector<128x128xf32> to vector<128x128xbf16>
    %c0_6 = arith.constant 0 : index
    %c0_7 = arith.constant 0 : index
    %9 = vector.load %arg4[%c0_6, %c0_7] : memref<128x128xbf16, #tpu.memory_space<vmem>>, vector<128x128xbf16>
    %cst_8 = arith.constant dense<0.000000e+00> : vector<128x128xf32>
    %10 = tpu.matmul %8, %9, %cst_8 {dimension_numbers = #tpu.dot_dimension_numbers<[1], [0], [0], [1], [0, 0, 1, 1], [], []>} : vector<128x128xbf16>, vector<128x128xbf16>, vector<128x128xf32> -> vector<128x128xf32>
    %c0_9 = arith.constant 0 : index
    %c0_10 = arith.constant 0 : index
    %11 = vector.load %arg1[%c0_9, %c0_10] : memref<128x128xbf16, #tpu.memory_space<vmem>>, vector<128x128xbf16>
    %12 = arith.truncf %10 : vector<128x128xf32> to vector<128x128xbf16>
    %cst_11 = arith.constant dense<0.000000e+00> : vector<128x128xf32>
    %13 = tpu.matmul %11, %12, %cst_11 {dimension_numbers = #tpu.dot_dimension_numbers<[1], [0], [0], [1], [0, 0, 1, 1], [], []>} : vector<128x128xbf16>, vector<128x128xbf16>, vector<128x128xf32> -> vector<128x128xf32>
    %c0_12 = arith.constant 0 : index
    %c0_13 = arith.constant 0 : index
    %14 = vector.load %arg5[%c0_12, %c0_13] : memref<1x128xf32, #tpu.memory_space<vmem>>, vector<1x128xf32>
    %15 = vector.broadcast %14 : vector<1x128xf32> to vector<128x128xf32>
    %16 = arith.addf %13, %15 : vector<128x128xf32>
    %c0_14 = arith.constant 0 : index
    %c0_15 = arith.constant 0 : index
    %17 = vector.load %arg6[%c0_14, %c0_15] : memref<128x128xf32, #tpu.memory_space<vmem>>, vector<128x128xf32>
    tpu.vector_store %arg6[%c0_14, %c0_15], %16 {strides = array<i32>} : memref<128x128xf32, #tpu.memory_space<vmem>>, vector<128x128xf32>,
    return
  }
  func.func @transform_0(%arg0: i32) -> (i32, i32) {
    %c0_i32 = arith.constant 0 : i32
    %c0_i32_0 = arith.constant 0 : i32
    %c0_i32_1 = arith.constant 0 : i32
    return %c0_i32, %c0_i32_0 : i32, i32
  }
  func.func @transform_1(%arg0: i32) -> (i32, i32) {
    %c0_i32 = arith.constant 0 : i32
    %c0_i32_0 = arith.constant 0 : i32
    %c0_i32_1 = arith.constant 0 : i32
    return %c0_i32, %c0_i32_0 : i32, i32
  }
  func.func @transform_2(%arg0: i32) -> (i32, i32) {
    %c0_i32 = arith.constant 0 : i32
    %c0_i32_0 = arith.constant 0 : i32
    %c0_i32_1 = arith.constant 0 : i32
    return %c0_i32, %c0_i32_0 : i32, i32
  }
  func.func @transform_3(%arg0: i32) -> (i32, i32) {
    %c0_i32 = arith.constant 0 : i32
    %c0_i32_0 = arith.constant 0 : i32
    %c0_i32_1 = arith.constant 0 : i32
    return %c0_i32, %c0_i32_0 : i32, i32
  }
  func.func @transform_4(%arg0: i32) -> (i32, i32) {
    %c0_i32 = arith.constant 0 : i32
    %c0_i32_0 = arith.constant 0 : i32
    %c0_i32_1 = arith.constant 0 : i32
    return %c0_i32, %c0_i32_0 : i32, i32
  }
  func.func @transform_5(%arg0: i32) -> (i32, i32) {
    %c0_i32 = arith.constant 0 : i32
    %c0_i32_0 = arith.constant 0 : i32
    %c0_i32_1 = arith.constant 0 : i32
    return %c0_i32, %c0_i32_0 : i32, i32
  }
}

</mosaic_0001>

<bundles_post_ra>
// kernel: tpu_custom_call.1
= control target key start
LH: loop header
LB: loop body
LE: loop exit
PB: predicated region body
PF: predicated region fallthrough
CT: control target
= control target key end

     0   :  { %10 = vsyncpa [#allocation3], 0  ;;  %s827_s0 = inlined_call_operand.hbm [shape: bf16[128,128], index: 0, kind: input, shape index: {}]   ;;  %s828_s1 = inlined_call_operand.hbm [shape: bf16[128,128], index: 1, kind: input, shape index: {}]   ;;  %s829_s2 = inlined_call_operand.vmem [shape: f32[1,128], index: 2, kind: input, shape index: {}]   ;;  %s830_s3 = inlined_call_operand.hbm [shape: bf16[128,128], index: 3, kind: input, shape index: {}]   ;;  %s831_s4 = inlined_call_operand.vmem [shape: f32[1,128], index: 4, kind: input, shape index: {}]   ;;  %s832_s5 = inlined_call_operand.hbm [shape: f32[128,128], index: 5, kind: output, shape index: {}]  }
   0x1   :  { %11 = vsyncpa [#allocation6], 0 }
   0x2   :  { %12 = vsyncpa [#allocation4], 0  ;;  %s30_s20 = sshll.u32 %s828_s1, 4  ;;  %s739_s21 = smov [#allocation5]   ;;  %s31_s20 = int_to_ptr.hbm [resolvable:$true] %s30_s20 }
   0x3   :  { %s32_s22 = sshll.u32 %s739_s21, 4  ;;  %s17_s25 = sshll.u32 %s827_s0, 4  ;;  %s33_s22 = int_to_ptr.vmem [resolvable:$true] %s32_s22  ;;  %s18_s25 = int_to_ptr.hbm [resolvable:$true] %s17_s25 }
   0x4   :  { %s740_s26 = smov 64   ;;  %s741_s27 = smov 4  }
   0x5   :  { %38 = dma.hbm_to_vmem [thread:$0]  %s31_s20, 1024, %s33_s22, [#allocation6], %s740_s26, %s740_s26, %s741_s27  }
   0x6   :  { %s742_s28 = smov [#allocation2]   ;;  %s45_s7 = sshll.u32 %s830_s3, 4  ;;  %s46_s7 = int_to_ptr.hbm [resolvable:$true] %s45_s7 }
   0x7   :  { %s19_s29 = sshll.u32 %s742_s28, 4  ;;  %s743_s1 = smov [#allocation7]   ;;  %s20_s29 = int_to_ptr.vmem [resolvable:$true] %s19_s29 }
   0x8   :  { %25 = dma.hbm_to_vmem [thread:$0]  %s18_s25, 1024, %s20_s29, [#allocation3], %s740_s26, %s740_s26, %s741_s27  }
   0x9   :  { %s47_s8 = sshll.u32 %s743_s1, 4  ;;  %s48_s8 = int_to_ptr.vmem [resolvable:$true] %s47_s8 }
   0xa   :  { %53 = dma.hbm_to_vmem [thread:$0]  %s46_s7, 1024, %s48_s8, [#allocation6], %s740_s26, %s740_s26, %s741_s27  }
   0xb   :  { %733 = dma.done.wait [#allocation3], 1024  }
   0xc   :  { %734 = vsyncadd [#allocation3], 4294966272 }
   0xd   :  { %735 = dma.done.wait [#allocation6], 2048  }
   0xe   :  { %736 = vsyncadd [#allocation6], 4294965248  ;;  %v594_v0 = vld [vmem:[#allocation5 + $0x38] sm:$0xff]  ;;  %v593_v1 = vld [vmem:[#allocation5 + $0x30] sm:$0xff]  ;;  %s469_s13 = sshll.u32 %s832_s5, 4  ;;  %s745_s14 = smov 128   ;;  %s470_s13 = int_to_ptr.hbm [resolvable:$true] %s469_s13 }
   0xf   :  { %200 = vmatpush.bf16.msra.mxu0 %v594_v0  ;;  %603 = vmatpush.bf16.msra.mxu3 %v594_v0  ;;  %v592_v2 = vld [vmem:[#allocation5 + $0x28] sm:$0xff]  ;;  %v591_v3 = vld [vmem:[#allocation5 + $0x20] sm:$0xff]  ;;  %v590_v4 = vld [vmem:[#allocation5 + $0x18] sm:$0xff]  ;;  %s746_s15 = smov 8  }
  0x10   :  { %v589_v5 = vld [vmem:[#allocation5 + $0x10] sm:$0xff]  ;;  %v588_v6 = vld [vmem:[#allocation5 + $0x8] sm:$0xff]  ;;  %v587_v7 = vld [vmem:[#allocation5] sm:$0xff] }
  0x11   :  { %v786_v8 = vld [vmem:[#allocation2] sm:$0xff]  ;;  %v788_v9 = vld [vmem:[#allocation2 + $0x30] sm:$0xff]  ;;  %v792_v10 = vld [vmem:[#allocation2 + $0x8] sm:$0xff] }
  0x12   :  { %v794_v11 = vld [vmem:[#allocation2 + $0x38] sm:$0xff]  ;;  %v798_v12 = vld [vmem:[#allocation2 + $0x10] sm:$0xff]  ;;  %v600_v16 = vld [vmem:[#allocation7 + $0x28] sm:$0xff] }
  0x13   :  { %201 = vmatpush.bf16.msra.mxu0 %v593_v1  ;;  %604 = vmatpush.bf16.msra.mxu3 %v593_v1  ;;  %v801_v13 = vld [vmem:[#allocation2 + $0x18] sm:$0xff]  ;;  %v601_v15 = vld [vmem:[#allocation7 + $0x30] sm:$0xff]  ;;  %v599_v17 = vld [vmem:[#allocation7 + $0x20] sm:$0xff] }
  0x14   :  { %v602_v14 = vld [vmem:[#allocation7 + $0x38] sm:$0xff]  ;;  %v804_v18 = vld [vmem:[#allocation2 + $0x20] sm:$0xff]  ;;  %v807_v19 = vld [vmem:[#allocation2 + $0x28] sm:$0xff] }
  0x15   :  { %337 = vmatpush.bf16.msra.mxu1 %v602_v14  ;;  %v598_v20 = vld [vmem:[#allocation7 + $0x18] sm:$0xff]  ;;  %v597_v21 = vld [vmem:[#allocation7 + $0x10] sm:$0xff]  ;;  %v596_v22 = vld [vmem:[#allocation7 + $0x8] sm:$0xff] }
  0x16   :  { %v595_v23 = vld [vmem:[#allocation7] sm:$0xff] }
  0x17   :  { %202 = vmatpush.bf16.msra.mxu0 %v592_v2  ;;  %605 = vmatpush.bf16.msra.mxu3 %v592_v2  ;;  %v635_v25 = vld [vmem:[%s829_s2] ss:$0 sm:$0xff] }
  0x19   :  { %338 = vmatpush.bf16.msra.mxu1 %v601_v15 }
  0x1b   :  { %203 = vmatpush.bf16.msra.mxu0 %v591_v3  ;;  %606 = vmatpush.bf16.msra.mxu3 %v591_v3 }
  0x1d   :  { %339 = vmatpush.bf16.msra.mxu1 %v600_v16 }
  0x1f   :  { %204 = vmatpush.bf16.msra.mxu0 %v590_v4  ;;  %607 = vmatpush.bf16.msra.mxu3 %v590_v4 }
  0x21   :  { %340 = vmatpush.bf16.msra.mxu1 %v599_v17 }
  0x23   :  { %205 = vmatpush.bf16.msra.mxu0 %v589_v5  ;;  %608 = vmatpush.bf16.msra.mxu3 %v589_v5 }
  0x25   :  { %341 = vmatpush.bf16.msra.mxu1 %v598_v20 }
  0x27   :  { %206 = vmatpush.bf16.msra.mxu0 %v588_v6  ;;  %609 = vmatpush.bf16.msra.mxu3 %v588_v6 }
  0x29   :  { %342 = vmatpush.bf16.msra.mxu1 %v597_v21 }
  0x2b   :  { %207 = vmatpush.bf16.msra.mxu0 %v587_v7  ;;  %610 = vmatpush.bf16.msra.mxu3 %v587_v7 }
  0x2d   :  { %343 = vmatpush.bf16.msra.mxu1 %v596_v22 }
  0x2e   :  { %208 = vmatmul.bf16.vlgmr.msra.gmra.mxu0 %v786_v8  ;;  %238 = vmatmul.bf16.vlgmr.msra.gmra.mxu3 %v788_v9 }
  0x2f   :  { %611 = vmatpush.bf16.msrb.mxu3 %v602_v14 }
  0x31   :  { %344 = vmatpush.bf16.msra.mxu1 %v595_v23 }
  0x33   :  { %612 = vmatpush.bf16.msrb.mxu3 %v601_v15 }
  0x37   :  { %613 = vmatpush.bf16.msrb.mxu3 %v600_v16 }
  0x3b   :  { %614 = vmatpush.bf16.msrb.mxu3 %v599_v17 }
  0x3e   :  { %213 = vmatmul.bf16.gmra.mxu0 %v792_v10  ;;  %243 = vmatmul.bf16.gmra.mxu3 %v794_v11 }
  0x3f   :  { %615 = vmatpush.bf16.msrb.mxu3 %v598_v20 }
  0x43   :  { %616 = vmatpush.bf16.msrb.mxu3 %v597_v21 }
  0x47   :  { %617 = vmatpush.bf16.msrb.mxu3 %v596_v22 }
  0x4b   :  { %618 = vmatpush.bf16.msrb.mxu3 %v595_v23 }
  0x4e   :  { %218 = vmatmul.bf16.gmra.mxu0 %v798_v12 }
  0x5e   :  { %223 = vmatmul.bf16.gmra.mxu0 %v801_v13 }
  0x6e   :  { %228 = vmatmul.bf16.gmra.mxu0 %v804_v18 }
  0x7e   :  { %233 = vmatmul.bf16.gmra.mxu0 %v807_v19 }
  0xab   :  { %v209_v24 = vpop.f32.mrf.mxu0 }
  0xac   :  { %v210_v27 = vadd.f32 %v635_v25, %v209_v24 }
  0xae   :  { %v249_v30 = vmax.f32 %v210_v27, 0.0 }
  0xb1   :  { %v239_v26 = vpop.f32.mrf.mxu3 }
  0xb2   :  { %v240_v32 = vadd.f32 %v635_v25, %v239_v26 }
  0xb3   :  { %v211_v28 = vpop.f32.mrf.mxu0 }
  0xb4   :  { %v212_v29 = vadd.f32 %v635_v25, %v211_v28  ;;  %v261_v35 = vmax.f32 %v240_v32, 0.0 }
  0xb6   :  { %v250_v31 = vmax.f32 %v212_v29, 0.0 }
  0xb8   :  { %v265_v33 = vpack.c.bf16 %v250_v31, %v249_v30 }
  0xb9   :  { %v241_v34 = vpop.f32.mrf.mxu3 }
  0xba   :  { %345 = vmatmul.bf16.vlgmr.msra.gmra.mxu1 %v265_v33  ;;  %v242_v36 = vadd.f32 %v635_v25, %v241_v34 }
  0xbb   :  { %v214_v37 = vpop.f32.mrf.mxu0 }
  0xbc   :  { %v262_v38 = vmax.f32 %v242_v36, 0.0  ;;  %v215_v41 = vadd.f32 %v635_v25, %v214_v37 }
  0xbe   :  { %v271_v39 = vpack.c.bf16 %v262_v38, %v261_v35  ;;  %v251_v44 = vmax.f32 %v215_v41, 0.0 }
  0xc0   :  { %375 = vmatmul.bf16.vlgmr.msrb.gmra.mxu3 %v271_v39 }
  0xc1   :  { %v244_v40 = vpop.f32.mrf.mxu3 }
  0xc2   :  { %v245_v46 = vadd.f32 %v635_v25, %v244_v40 }
  0xc3   :  { %v216_v42 = vpop.f32.mrf.mxu0 }
  0xc4   :  { %v217_v43 = vadd.f32 %v635_v25, %v216_v42  ;;  %v263_v49 = vmax.f32 %v245_v46, 0.0 }
  0xc6   :  { %v252_v45 = vmax.f32 %v217_v43, 0.0 }
  0xc8   :  { %v266_v47 = vpack.c.bf16 %v252_v45, %v251_v44 }
  0xc9   :  { %v246_v48 = vpop.f32.mrf.mxu3 }
  0xca   :  { %350 = vmatmul.bf16.gmra.mxu1 %v266_v47  ;;  %v247_v50 = vadd.f32 %v635_v25, %v246_v48 }
  0xcb   :  { %v219_v51 = vpop.f32.mrf.mxu0 }
  0xcc   :  { %v264_v52 = vmax.f32 %v247_v50, 0.0  ;;  %v220_v54 = vadd.f32 %v635_v25, %v219_v51 }
  0xce   :  { %v272_v53 = vpack.c.bf16 %v264_v52, %v263_v49  ;;  %v253_v57 = vmax.f32 %v220_v54, 0.0  ;;  %v636_v49 = vld [vmem:[%s831_s4] ss:$0 sm:$0xff]  ;;  %s744_s4 = smov [#allocation8]  }
  0xcf   :  { %s467_s10 = sshll.u32 %s744_s4, 4  ;;  %s468_s10 = int_to_ptr.vmem [resolvable:$true] %s467_s10 }
  0xd0   :  { %380 = vmatmul.bf16.gmra.mxu3 %v272_v53 }
  0xd3   :  { %v221_v55 = vpop.f32.mrf.mxu0 }
  0xd4   :  { %v222_v56 = vadd.f32 %v635_v25, %v221_v55 }
  0xd6   :  { %v254_v58 = vmax.f32 %v222_v56, 0.0 }
  0xd8   :  { %v267_v59 = vpack.c.bf16 %v254_v58, %v253_v57 }
  0xda   :  { %355 = vmatmul.bf16.gmra.mxu1 %v267_v59 }
  0xdb   :  { %v224_v60 = vpop.f32.mrf.mxu0 }
  0xdc   :  { %v225_v61 = vadd.f32 %v635_v25, %v224_v60 }
  0xde   :  { %v255_v0 = vmax.f32 %v225_v61, 0.0 }
  0xe3   :  { %v226_v62 = vpop.f32.mrf.mxu0 }
  0xe4   :  { %v227_v63 = vadd.f32 %v635_v25, %v226_v62 }
  0xe6   :  { %v256_v1 = vmax.f32 %v227_v63, 0.0 }
  0xe8   :  { %v268_v2 = vpack.c.bf16 %v256_v1, %v255_v0 }
  0xea   :  { %360 = vmatmul.bf16.gmra.mxu1 %v268_v2 }
  0xeb   :  { %v229_v3 = vpop.f32.mrf.mxu0 }
  0xec   :  { %v230_v4 = vadd.f32 %v635_v25, %v229_v3 }
  0xee   :  { %v257_v7 = vmax.f32 %v230_v4, 0.0 }
  0xf3   :  { %v231_v5 = vpop.f32.mrf.mxu0 }
  0xf4   :  { %v232_v6 = vadd.f32 %v635_v25, %v231_v5 }
  0xf6   :  { %v258_v14 = vmax.f32 %v232_v6, 0.0 }
  0xf8   :  { %v269_v15 = vpack.c.bf16 %v258_v14, %v257_v7 }
  0xfa   :  { %365 = vmatmul.bf16.gmra.mxu1 %v269_v15 }
  0xfb   :  { %v234_v16 = vpop.f32.mrf.mxu0 }
  0xfc   :  { %v235_v17 = vadd.f32 %v635_v25, %v234_v16 }
  0xfe   :  { %v259_v22 = vmax.f32 %v235_v17, 0.0 }
 0x103   :  { %v236_v20 = vpop.f32.mrf.mxu0 }
 0x104   :  { %v237_v21 = vadd.f32 %v635_v25, %v236_v20 }
 0x106   :  { %v260_v23 = vmax.f32 %v237_v21, 0.0 }
 0x108   :  { %v270_v24 = vpack.c.bf16 %v260_v23, %v259_v22 }
 0x10a   :  { %370 = vmatmul.bf16.gmra.mxu1 %v270_v24 }
 0x137   :  { %v346_v26 = vpop.f32.mrf.mxu1 }
 0x13f   :  { %v348_v27 = vpop.f32.mrf.mxu1 }
 0x140   :  { %v386_v28 = vpack.c.bf16 %v348_v27, %v346_v26 }
 0x143   :  { %v376_v29 = vpop.f32.mrf.mxu3 }
 0x147   :  { %v351_v30 = vpop.f32.mrf.mxu1 }
 0x14b   :  { %v378_v31 = vpop.f32.mrf.mxu3 }
 0x14c   :  { %v392_v38 = vpack.c.bf16 %v378_v31, %v376_v29 }
 0x14f   :  { %v353_v32 = vpop.f32.mrf.mxu1 }
 0x150   :  { %v387_v33 = vpack.c.bf16 %v353_v32, %v351_v30 }
 0x153   :  { %v381_v34 = vpop.f32.mrf.mxu3 }
 0x157   :  { %v356_v35 = vpop.f32.mrf.mxu1 }
 0x15b   :  { %v383_v36 = vpop.f32.mrf.mxu3 }
 0x15c   :  { %v393_v37 = vpack.c.bf16 %v383_v36, %v381_v34 }
 0x15e   :  { %398 = vmatpush.bf16.msra.mxu2 %v393_v37  ;;  %619 = vmatpush.bf16.msra.mxu3 %v393_v37 }
 0x15f   :  { %v358_v25 = vpop.f32.mrf.mxu1 }
 0x160   :  { %v388_v48 = vpack.c.bf16 %v358_v25, %v356_v35 }
 0x162   :  { %399 = vmatpush.bf16.msra.mxu2 %v392_v38  ;;  %620 = vmatpush.bf16.msra.mxu3 %v392_v38 }
 0x167   :  { %v361_v39 = vpop.f32.mrf.mxu1 }
 0x16f   :  { %v363_v40 = vpop.f32.mrf.mxu1 }
 0x170   :  { %v389_v47 = vpack.c.bf16 %v363_v40, %v361_v39 }
 0x177   :  { %v366_v41 = vpop.f32.mrf.mxu1 }
 0x17f   :  { %v368_v42 = vpop.f32.mrf.mxu1 }
 0x180   :  { %v390_v46 = vpack.c.bf16 %v368_v42, %v366_v41 }
 0x187   :  { %v371_v43 = vpop.f32.mrf.mxu1 }
 0x18f   :  { %v373_v44 = vpop.f32.mrf.mxu1 }
 0x190   :  { %v391_v45 = vpack.c.bf16 %v373_v44, %v371_v43 }
 0x192   :  { %400 = vmatpush.bf16.msra.mxu2 %v391_v45  ;;  %621 = vmatpush.bf16.msra.mxu3 %v391_v45 }
 0x196   :  { %401 = vmatpush.bf16.msra.mxu2 %v390_v46  ;;  %622 = vmatpush.bf16.msra.mxu3 %v390_v46 }
 0x19a   :  { %402 = vmatpush.bf16.msra.mxu2 %v389_v47  ;;  %623 = vmatpush.bf16.msra.mxu3 %v389_v47 }
 0x19e   :  { %403 = vmatpush.bf16.msra.mxu2 %v388_v48  ;;  %624 = vmatpush.bf16.msra.mxu3 %v388_v48 }
 0x1a2   :  { %404 = vmatpush.bf16.msra.mxu2 %v387_v33  ;;  %625 = vmatpush.bf16.msra.mxu3 %v387_v33 }
 0x1a6   :  { %405 = vmatpush.bf16.msra.mxu2 %v386_v28  ;;  %626 = vmatpush.bf16.msra.mxu3 %v386_v28 }
 0x1a9   :  { %406 = vmatmul.bf16.vlgmr.msra.gmra.mxu2 %v786_v8  ;;  %436 = vmatmul.bf16.vlgmr.msra.gmra.mxu3 %v788_v9 }
 0x1b9   :  { %411 = vmatmul.bf16.gmra.mxu2 %v792_v10  ;;  %441 = vmatmul.bf16.gmra.mxu3 %v794_v11 }
 0x1c9   :  { %416 = vmatmul.bf16.gmra.mxu2 %v798_v12 }
 0x1d9   :  { %421 = vmatmul.bf16.gmra.mxu2 %v801_v13 }
 0x1e9   :  { %426 = vmatmul.bf16.gmra.mxu2 %v804_v18 }
 0x1f9   :  { %431 = vmatmul.bf16.gmra.mxu2 %v807_v19 }
 0x22c   :  { %v407_v50 = vpop.f32.mrf.mxu2  ;;  %v437_v52 = vpop.f32.mrf.mxu3 }
 0x22d   :  { %v408_v8 = vadd.f32 %v636_v49, %v407_v50  ;;  %v438_v18 = vadd.f32 %v636_v49, %v437_v52 }
 0x22f   :  { %447 = vst [vmem:[#allocation8] sm:$0xff] %v408_v8 }
 0x230   :  { %459 = vst [vmem:[#allocation8 + $0x60] sm:$0xff] %v438_v18 }
 0x234   :  { %v409_v9 = vpop.f32.mrf.mxu2  ;;  %v439_v53 = vpop.f32.mrf.mxu3 }
 0x235   :  { %v410_v51 = vadd.f32 %v636_v49, %v409_v9  ;;  %v440_v55 = vadd.f32 %v636_v49, %v439_v53 }
 0x237   :  { %448 = vst [vmem:[#allocation8 + $0x8] sm:$0xff] %v410_v51 }
 0x238   :  { %460 = vst [vmem:[#allocation8 + $0x68] sm:$0xff] %v440_v55 }
 0x23c   :  { %v412_v10 = vpop.f32.mrf.mxu2  ;;  %v442_v57 = vpop.f32.mrf.mxu3 }
 0x23d   :  { %v413_v11 = vadd.f32 %v636_v49, %v412_v10  ;;  %v443_v59 = vadd.f32 %v636_v49, %v442_v57 }
 0x23f   :  { %449 = vst [vmem:[#allocation8 + $0x10] sm:$0xff] %v413_v11 }
 0x240   :  { %461 = vst [vmem:[#allocation8 + $0x70] sm:$0xff] %v443_v59 }
 0x244   :  { %v414_v12 = vpop.f32.mrf.mxu2  ;;  %v444_v61 = vpop.f32.mrf.mxu3 }
 0x245   :  { %v415_v13 = vadd.f32 %v636_v49, %v414_v12  ;;  %v445_v63 = vadd.f32 %v636_v49, %v444_v61 }
 0x247   :  { %450 = vst [vmem:[#allocation8 + $0x18] sm:$0xff] %v415_v13 }
 0x248   :  { %462 = vst [vmem:[#allocation8 + $0x78] sm:$0xff] %v445_v63 }
 0x24c   :  { %v417_v19 = vpop.f32.mrf.mxu2 }
 0x24d   :  { %v418_v54 = vadd.f32 %v636_v49, %v417_v19 }
 0x24f   :  { %451 = vst [vmem:[#allocation8 + $0x20] sm:$0xff] %v418_v54 }
 0x254   :  { %v419_v56 = vpop.f32.mrf.mxu2 }
 0x255   :  { %v420_v58 = vadd.f32 %v636_v49, %v419_v56 }
 0x257   :  { %452 = vst [vmem:[#allocation8 + $0x28] sm:$0xff] %v420_v58 }
 0x25c   :  { %v422_v60 = vpop.f32.mrf.mxu2 }
 0x25d   :  { %v423_v62 = vadd.f32 %v636_v49, %v422_v60 }
 0x25f   :  { %453 = vst [vmem:[#allocation8 + $0x30] sm:$0xff] %v423_v62 }
 0x264   :  { %v424_v0 = vpop.f32.mrf.mxu2 }
 0x265   :  { %v425_v1 = vadd.f32 %v636_v49, %v424_v0 }
 0x267   :  { %454 = vst [vmem:[#allocation8 + $0x38] sm:$0xff] %v425_v1 }
 0x26c   :  { %v427_v2 = vpop.f32.mrf.mxu2 }
 0x26d   :  { %v428_v3 = vadd.f32 %v636_v49, %v427_v2 }
 0x26f   :  { %455 = vst [vmem:[#allocation8 + $0x40] sm:$0xff] %v428_v3 }
 0x274   :  { %v429_v4 = vpop.f32.mrf.mxu2 }
 0x275   :  { %v430_v5 = vadd.f32 %v636_v49, %v429_v4 }
 0x277   :  { %456 = vst [vmem:[#allocation8 + $0x48] sm:$0xff] %v430_v5 }
 0x27c   :  { %v432_v6 = vpop.f32.mrf.mxu2 }
 0x27d   :  { %v433_v7 = vadd.f32 %v636_v49, %v432_v6 }
 0x27f   :  { %457 = vst [vmem:[#allocation8 + $0x50] sm:$0xff] %v433_v7 }
 0x284   :  { %v434_v14 = vpop.f32.mrf.mxu2 }
 0x285   :  { %v435_v15 = vadd.f32 %v636_v49, %v434_v14 }
 0x287   :  { %458 = vst [vmem:[#allocation8 + $0x58] sm:$0xff] %v435_v15 }
 0x288   :  { %475 = dma.vmem_to_hbm [thread:$0]  %s468_s10, 2048, %s470_s13, [#allocation4], %s745_s14, %s745_s14, %s746_s15  }
 0x289   :  { %737 = dma.done.wait [#allocation4], 2048  }
 0x28a   :  { %738 = vsyncadd [#allocation4], 4294965248 }
 0x28b   :  { %480 = vsyncpa [#allocation3], 1 }
 0x28c   :  { %481 = vsyncpa [#allocation6], 1 }
 0x28d   :  { %482 = vsyncpa [#allocation4], 1 }

</bundles_post_ra>
